<compile_context>
chip_gen: v7x
topology: tpu7x:2x2x1
jax: 0.10.0
libtpu: 0.0.40
codegen_flags: <defaults>
</compile_context>

<pallas_src>
import math

import jax
import jax.numpy as jnp
from jax import lax
from jax.experimental import pallas as pl
from jax.experimental.pallas import tpu as pltpu

_TWO_PI = 2.0 * math.pi
_HALF_PI = 0.5 * math.pi

# Double-buffered (input + output) block budget; comfortably under the
# default scoped VMEM limit on every generation (v5e 16 MiB, v6e/v7x 32 MiB).
_VMEM_BUDGET_BYTES = 12 * (1 << 20)


def _sinusoidal_emb_kernel(x_ref, p_ref, o_ref):
    # x_ref: (Bb, 1)  f32 timesteps
    # p_ref: (2, D)   f32, D = dim + 1
    #        row 0: 2*pi * [0, w_0..w_{h-1}, w_0..w_{h-1}]   (scale)
    #        row 1: [0, 0 x half, (pi/2) x half]              (phase)
    # o_ref: (Bb, D)  f32, layout [x, sin(x*w*2pi), cos(x*w*2pi)]
    x = x_ref[...]                                    # (Bb, 1)
    scale = p_ref[0:1, :]                             # (1, D)
    phase = p_ref[1:2, :]                             # (1, D)

    t = x * scale + phase                             # (Bb, D) VPU mul+add
    fouriered = jnp.sin(t)                            # single EUP pass (cos via +pi/2)

    col = lax.broadcasted_iota(jnp.int32, t.shape, 1)
    xb = jnp.broadcast_to(x, t.shape)
    o_ref[...] = jnp.where(col == 0, xb, fouriered)   # col 0 -> raw x


def _pick_batch_block(b, d_out):
    # Largest bb (multiple of 8) whose double-buffered in+out blocks fit the
    # VMEM budget; small batches run in a single grid step.
    bytes_per_row = 4 * (d_out + 1)                   # f32 output row + f32 input scalar
    bb_max = _VMEM_BUDGET_BYTES // (2 * bytes_per_row)
    bb_max = max(8, (bb_max // 8) * 8)
    return b if b <= bb_max else bb_max


def random_or_learned_sinusoidal_pos_emb(x, weights):
    """x: (B,) timesteps; weights: (half_dim,) parameter. Returns (B, 2*half_dim + 1)."""
    (B,) = x.shape
    (half_dim,) = weights.shape
    d_out = 2 * half_dim + 1

    x_col = x.reshape(B, 1).astype(jnp.float32)
    w_f32 = weights.astype(jnp.float32)

    # Host-built (constant-foldable) parameter block, 2*pi folded in:
    #   row 0: 2*pi * [0, w, w]
    #   row 1: [0, 0 x half, (pi/2) x half]   (so sin(col>half) == cos)
    zero1 = jnp.zeros((1,), jnp.float32)
    scale_row = jnp.concatenate([zero1, w_f32, w_f32]) * _TWO_PI
    phase_row = jnp.concatenate(
        [zero1,
         jnp.zeros((half_dim,), jnp.float32),
         jnp.full((half_dim,), _HALF_PI, jnp.float32)])
    params = jnp.stack([scale_row, phase_row], axis=0)          # (2, d_out)

    bb = _pick_batch_block(B, d_out)
    grid = (pl.cdiv(B, bb),)

    return pl.pallas_call(
        _sinusoidal_emb_kernel,
        out_shape=jax.ShapeDtypeStruct((B, d_out), jnp.float32),
        grid_spec=pltpu.PrefetchScalarGridSpec(
            num_scalar_prefetch=0,
            grid=grid,
            in_specs=[
                pl.BlockSpec((bb, 1), lambda i: (i, 0)),
                pl.BlockSpec((2, d_out), lambda i: (0, 0)),
            ],
            out_specs=pl.BlockSpec((bb, d_out), lambda i: (i, 0)),
        ),
        compiler_params=pltpu.CompilerParams(
            dimension_semantics=("parallel",)),
        cost_estimate=pl.CostEstimate(
            flops=3 * B * d_out,                 # mul + add + select
            transcendentals=B * d_out,           # single sin pass
            bytes_accessed=4 * (B + 2 * d_out + B * d_out)),
    )(x_col, params)


def _reference(x, weights):
    # Pure-JAX mirror of the PyTorch module.
    freqs = x[:, None] * weights[None, :] * 2 * math.pi
    fouriered = jnp.concatenate([jnp.sin(freqs), jnp.cos(freqs)], axis=-1)
    return jnp.concatenate([x[:, None], fouriered], axis=-1)


if __name__ == "__main__":
    key = jax.random.PRNGKey(0)
    kx, kw = jax.random.split(key)

    B, dim = 8, 32                      # dim must be even; half_dim = 16
    half_dim = dim // 2
    x = jax.random.uniform(kx, (B,), dtype=jnp.float32)            # timesteps
    weights = jax.random.normal(kw, (half_dim,), dtype=jnp.float32)

    out = random_or_learned_sinusoidal_pos_emb(x, weights)
    out = jax.block_until_ready(out)

    ref = _reference(x, weights)
    assert out.shape == (B, dim + 1)
    assert jnp.allclose(out, ref, atol=1e-4, rtol=1e-4)
    print("KERNEL_OK")
</pallas_src>

<mosaic_0001>
module attributes {stable_mosaic.version = 11 : i64} {
  func.func @_sinusoidal_emb_kernel(%arg0: i32, %arg1: memref<8x1xf32, #tpu.memory_space<vmem>>, %arg2: memref<2x33xf32, #tpu.memory_space<vmem>>, %arg3: memref<8x33xf32, #tpu.memory_space<vmem>>) attributes {dimension_semantics = [#tpu.dimension_semantics<parallel>], iteration_bounds = array<i64: 1>, scalar_prefetch = 0 : i64, scratch_operands = 0 : i64, tpu.core_type = #tpu.core_type<tc>, window_params = [{transform_indices = @transform_0, window_bounds = array<i64: 8, 1>}, {pipeline_mode = #tpu.pipeline_mode<synchronous>, transform_indices = @transform_1, window_bounds = array<i64: 2, 33>}, {transform_indices = @transform_2, window_bounds = array<i64: 8, 33>}]} {
    %c0 = arith.constant 0 : index
    %c0_0 = arith.constant 0 : index
    %0 = vector.load %arg1[%c0, %c0_0] : memref<8x1xf32, #tpu.memory_space<vmem>>, vector<8x1xf32>
    %c0_1 = arith.constant 0 : index
    %c0_2 = arith.constant 0 : index
    %1 = vector.load %arg2[%c0_1, %c0_2] : memref<2x33xf32, #tpu.memory_space<vmem>>, vector<1x33xf32>
    %c1 = arith.constant 1 : index
    %c0_3 = arith.constant 0 : index
    %2 = vector.load %arg2[%c1, %c0_3] : memref<2x33xf32, #tpu.memory_space<vmem>>, vector<1x33xf32>
    %3 = vector.broadcast %0 : vector<8x1xf32> to vector<8x33xf32>
    %4 = vector.broadcast %1 : vector<1x33xf32> to vector<8x33xf32>
    %5 = arith.mulf %3, %4 : vector<8x33xf32>
    %6 = vector.broadcast %2 : vector<1x33xf32> to vector<8x33xf32>
    %7 = arith.addf %5, %6 : vector<8x33xf32>
    %8 = math.sin %7 : vector<8x33xf32>
    %9 = tpu.iota {dimensions = array<i32: 1>} : vector<8x33xi32>
    %10 = vector.shape_cast %0 : vector<8x1xf32> to vector<8x1xf32>
    %11 = vector.broadcast %10 : vector<8x1xf32> to vector<8x33xf32>
    %c0_i32 = arith.constant 0 : i32
    %12 = vector.broadcast %c0_i32 : i32 to vector<8x33xi32>
    %13 = arith.cmpi eq, %9, %12 : vector<8x33xi32>
    %14 = arith.select %13, %11, %8 : vector<8x33xi1>, vector<8x33xf32>
    %c0_4 = arith.constant 0 : index
    %c0_5 = arith.constant 0 : index
    %15 = vector.load %arg3[%c0_4, %c0_5] : memref<8x33xf32, #tpu.memory_space<vmem>>, vector<8x33xf32>
    tpu.vector_store %arg3[%c0_4, %c0_5], %14 {strides = array<i32>} : memref<8x33xf32, #tpu.memory_space<vmem>>, vector<8x33xf32>,
    return
  }
  func.func @transform_0(%arg0: i32) -> (i32, i32) {
    %c0_i32 = arith.constant 0 : i32
    %c0_i32_0 = arith.constant 0 : i32
    return %arg0, %c0_i32 : i32, i32
  }
  func.func @transform_1(%arg0: i32) -> (i32, i32) {
    %c0_i32 = arith.constant 0 : i32
    %c0_i32_0 = arith.constant 0 : i32
    %c0_i32_1 = arith.constant 0 : i32
    return %c0_i32, %c0_i32_0 : i32, i32
  }
  func.func @transform_2(%arg0: i32) -> (i32, i32) {
    %c0_i32 = arith.constant 0 : i32
    %c0_i32_0 = arith.constant 0 : i32
    return %arg0, %c0_i32 : i32, i32
  }
}

</mosaic_0001>

<bundles_post_ra>
// kernel: tpu_custom_call.1
= control target key start
LH: loop header
LB: loop body
LE: loop exit
PB: predicated region body
PF: predicated region fallthrough
CT: control target
= control target key end

     0   :  { %v201_v1 = vmov 0   ;;  %s270_s0 = inlined_call_operand.vmem [shape: f32[8,1], index: 0, kind: input, shape index: {}]   ;;  %s271_s1 = inlined_call_operand.vmem [shape: f32[2,33], index: 1, kind: input, shape index: {}]   ;;  %s272_s2 = inlined_call_operand.hbm [shape: f32[8,33], index: 2, kind: output, shape index: {}]  }
   0x1   :  { %v12_v0 = vld [vmem:[%s270_s0] sm:$0xff]  ;;  %172 = vset.pattern.permute.xlu0 %v201_v1 }
   0x2   :  { %17 = vperm.xlu0 %172, %v12_v0  }
   0x3   :  { %7 = vsyncpa [#allocation3], 0  ;;  %v154_v2 = vld [vmem:[%s271_s1] ss:$0 sm:$0xff]  ;;  %v155_v3 = vld [vmem:[%s271_s1 + $0x1] ss:$0 sm:$0xff] }
   0x4   :  { %v202_v17 = vmov 683565275   ;;  %v203_v19 = vmov 2475754826   ;;  %v204_v22 = vmov 2131351028  }
   0x5   :  { %v205_v25 = vmov 2102212464   ;;  %v206_v28 = vmov 920167782   ;;  %v207_v31 = vmov 1326507024  }
   0x6   :  { %s208_s0 = smov [#allocation2]   ;;  %vm138_vm14 = vcmask 269312  }
   0x7   :  { %s146_s1 = sshll.u32 %s208_s0, 4  ;;  %s147_s1 = int_to_ptr.vmem [resolvable:$true] %s146_s1 }
   0x8   :  { %s177_s15 = scalar_lea.vmem %s147_s1, 128  ;;  %p182_p1 = scmp.lt.s32.totalorder %s147_s1, %s147_s1 }
   0x9   :  { %p178_p0 = scmp.ne.s32.totalorder %s147_s1, %s177_s15  ;;  %p183_p2 = scmp.lt.s32.totalorder %s177_s15, %s177_s15 }
   0xb   :  { %p184_p3 = por %p183_p2, %p182_p1 }
   0xd   :  { %p185_p4 = pnand %p184_p3, %p178_p0 }
  0x81   :  { %v233_v4 = vpop.permute.xlu0 %17 }
  0x82   :  { %v24_v5 = vmul.f32 %v154_v2, %v233_v4 }
  0x84   :  { %v236_v6 = vadd.f32 %v155_v3, %v24_v5 }
  0x86   :  { %v33_v7 = vand.u32 2139095040, %v236_v6  ;;  %v30_v11 = vand.u32 2147483647, %v236_v6  ;;  %vm32_vm7 = vcmp.lt.s32.totalorder %v236_v6, 0  ;;  %vm122_vm13 = vweird.f32 %v236_v6 }
  0x88   :  { %v34_v8 = vshrl.u32 %v33_v7, 23  ;;  %v37_v14 = vand.u32 8388607, %v30_v11  ;;  %vm31_vm8 = vcmp.le.f32.partialorder %v30_v11, 0.7853982 }
  0x8a   :  { %v156_v9 = vadd.s32 4294967169, %v34_v8  ;;  %v38_v33 = vor.u32 8388608, %v37_v14 }
  0x8c   :  { %v40_v10 = vadd.s32 1, %v156_v9  ;;  %v78_v47 = vshll.u32 %v38_v33, 8 }
  0x8e   :  { %vm41_vm0 = vcmp.gt.s32.totalorder %v40_v10, 0 }
  0x8f   :  { %v42_v12 = vsel %vm41_vm0, %v40_v10, 0 }
  0x90   :  { %v44_v13 = vand.u32 31, %v42_v12  ;;  %v43_v16 = vshrl.u32 %v42_v12, 5 }
  0x92   :  { %v45_v15 = vsub.s32 32, %v44_v13  ;;  %v47_v18 = vshll.u32 %v202_v17, %v44_v13  ;;  %v50_v20 = vshll.u32 %v203_v19, %v44_v13  ;;  %v53_v24 = vshll.u32 %v204_v22, %v44_v13 }
  0x93   :  { %v56_v27 = vshll.u32 %v205_v25, %v44_v13  ;;  %v59_v30 = vshll.u32 %v206_v28, %v44_v13  ;;  %vm62_vm1 = vcmp.lt.s32.totalorder %v43_v16, 1  ;;  %vm65_vm2 = vcmp.lt.s32.totalorder %v43_v16, 4 }
  0x94   :  { %v48_v21 = vshrl.u32 %v203_v19, %v45_v15  ;;  %v51_v23 = vshrl.u32 %v204_v22, %v45_v15  ;;  %v54_v26 = vshrl.u32 %v205_v25, %v45_v15  ;;  %v57_v29 = vshrl.u32 %v206_v28, %v45_v15 }
  0x95   :  { %v60_v32 = vshrl.u32 %v207_v31, %v45_v15  ;;  %v46_v42 = vshrl.u32 %v202_v17, %v45_v15  ;;  %vm64_vm3 = vcmp.lt.s32.totalorder %v43_v16, 3  ;;  %vm63_vm4 = vcmp.lt.s32.totalorder %v43_v16, 2 }
  0x96   :  { %v49_v34 = vor.u32 %v48_v21, %v47_v18  ;;  %v52_v35 = vor.u32 %v51_v23, %v50_v20  ;;  %v55_v36 = vor.u32 %v54_v26, %v53_v24  ;;  %v58_v37 = vor.u32 %v57_v29, %v56_v27 }
  0x97   :  { %v61_v38 = vor.u32 %v60_v32, %v59_v30  ;;  %v134_v28 = vlaneseq }
  0x98   :  { %v67_v39 = vsel %vm65_vm2, %v55_v36, 2102212464  ;;  %v70_v40 = vsel %vm62_vm1, %v49_v34, %v52_v35  ;;  %v74_v41 = vsel %vm62_vm1, %v52_v35, %v55_v36  ;;  %v71_v43 = vsel %vm65_vm2, %v58_v37, 920167782 }
  0x99   :  { %v75_v44 = vsel %vm65_vm2, %v61_v38, 1326507024  ;;  %v72_v45 = vsel %vm64_vm3, %v55_v36, %v71_v43  ;;  %v66_v48 = vsel %vm62_vm1, %v46_v42, %v49_v34  ;;  %v68_v49 = vsel %vm64_vm3, %v52_v35, %v67_v39 }
  0x9a   :  { %v76_v46 = vsel %vm64_vm3, %v58_v37, %v75_v44  ;;  %v73_v50 = vsel %vm63_vm4, %v70_v40, %v72_v45  ;;  %v69_v56 = vsel %vm63_vm4, %v66_v48, %v68_v49  ;;  %v135_v31 = vand.u32 127, %v134_v28 }
  0x9b   :  { %v77_v51 = vsel %vm63_vm4, %v74_v41, %v76_v46  ;;  %v245_v54 = vmul.u32.u64.low %v78_v47, %v73_v50  ;;  %v246_v55 = vmul.u32.u64.high %v78_v47, %v73_v50, %v245_v54  ;;  %v85_v58 = vmul.u32 %v78_v47, %v69_v56 }
  0x9c   :  { %v242_v52 = vmul.u32.u64.low %v78_v47, %v77_v51  ;;  %v243_v53 = vmul.u32.u64.high %v78_v47, %v77_v51, %v242_v52  ;;  %vm136_vm11 = vcmp.eq.s32.totalorder %v135_v31, 0 }
  0x9d   :  { %v88_v57 = vadd.s32 1, %v246_v55 }
  0x9e   :  { %vm87_vm5 = vc.u32 %v243_v53, %v245_v54  ;;  %v86_v8 = vadd.s32 %v245_v54, %v243_v53 }
  0x9f   :  { %v89_v59 = vsel %vm87_vm5, %v88_v57, %v246_v55 }
  0xa0   :  { %v90_v60 = vadd.s32 %v89_v59, %v85_v58 }
  0xa2   :  { %v91_v61 = vadd.s32 536870912, %v90_v60 }
  0xa4   :  { %v92_v62 = vshrl.u32 %v91_v61, 30 }
  0xa6   :  { %v93_v63 = vshll.u32 %v92_v62, 30  ;;  %v116_v21 = vsub.s32 4, %v92_v62 }
  0xa8   :  { %v94_v0 = vsub.s32 %v90_v60, %v93_v63  ;;  %v117_v24 = vsel %vm32_vm7, %v116_v21, %v92_v62 }
  0xa9   :  { %v119_v26 = vsel %vm31_vm8, 0, %v117_v24 }
  0xaa   :  { %v96_v1 = vsub.s32 0, %v94_v0  ;;  %v123_v27 = vadd.s32 3, %v119_v26 }
  0xac   :  { %v157_v2 = vmin.u32 %v96_v1, %v94_v0  ;;  %v124_v29 = vand.u32 3, %v123_v27 }
  0xae   :  { %v98_v3 = vclz %v157_v2  ;;  %vm129_vm9 = vcmp.eq.s32.totalorder %v124_v29, 2  ;;  %vm126_vm10 = vcmp.eq.s32.totalorder %v124_v29, 0  ;;  %vm125_vm12 = vcmp.lt.s32.totalorder %v124_v29, 2 }
  0xb0   :  { %v158_v5 = vadd.s32 4294967294, %v98_v3 }
  0xb2   :  { %vm159_vm6 = vcmp.lt.s32.totalorder %v158_v5, 0 }
  0xb3   :  { %v101_v7 = vsel %vm159_vm6, 0, %v158_v5 }
  0xb4   :  { %v102_v9 = vsub.s32 32, %v101_v7  ;;  %v106_v10 = vsub.s32 4294967266, %v101_v7  ;;  %v103_v12 = vshll.u32 %v94_v0, %v101_v7 }
  0xb6   :  { %v104_v13 = vshrl.u32 %v86_v8, %v102_v9  ;;  %v107_v14 = vadd.s32 127, %v106_v10 }
  0xb8   :  { %v105_v15 = vor.u32 %v104_v13, %v103_v12  ;;  %v108_v16 = vshll.u32 %v107_v14, 23 }
  0xba   :  { %v109_v17 = vor.u32 4788187, %v108_v16  ;;  %v112_v19 = vcvt.s32.f32 %v105_v15 }
  0xbc   :  { %v110_v18 = vand.u32 2147483647, %v109_v17 }
  0xbe   :  { %v113_v20 = vmul.f32 %v112_v19, %v110_v18 }
  0xc0   :  { %v114_v22 = vxor.u32 2147483648, %v113_v20 }
  0xc2   :  { %v115_v23 = vsel %vm32_vm7, %v114_v22, %v113_v20 }
  0xc3   :  { %v118_v25 = vsel %vm31_vm8, %v236_v6, %v115_v23 }
  0xc4   :  { %173 = vcosq.f32 %v118_v25 }
  0xc5   :  { %175 = vsinq.f32 %v118_v25 }
  0xce   :  { %v174_v30 = vpop.eup %173 }
  0xcf   :  { %v176_v32 = vpop.eup %175  ;;  %v130_v33 = vxor.u32 2147483648, %v174_v30 }
  0xd0   :  { %v127_v34 = vxor.u32 2147483648, %v176_v32 }
  0xd1   :  { %v131_v35 = vsel %vm129_vm9, %v130_v33, %v176_v32 }
  0xd2   :  { %v128_v11 = vsel %vm126_vm10, %v174_v30, %v127_v34 }
  0xd3   :  { %v132_v36 = vsel %vm125_vm12, %v128_v11, %v131_v35 }
  0xd4   :  { %v133_v37 = vsel %vm122_vm13, nan, %v132_v36 }
  0xd5   :  { %v137_v38 = vsel %vm136_vm11, %v233_v4, %v133_v37 }
  0xd6   :  { %139 = vst.msk [vmem:[#allocation2] sm:$0xff] %vm138_vm14, %v137_v38 }
  0xd7   :  { %188 = shalt.err (!%p185_p4)
}
  0xd8   :  { %s189_s18 = scalar_lea.hbm %s272_s2, 128 }
  0xd9   :  { %p190_p5 = scmp.ne.s32.totalorder %s272_s2, %s189_s18  ;;  %p193_p6 = scmp.lt.u32.totalorder %s189_s18, %s272_s2 }
  0xdb   :  { %p195_p7 = pnand %p193_p6, %p190_p5 }
  0xdd   :  { %198 = shalt.err (!%p195_p7)
}
  0xde   :  { %149 = dma.vmem_to_hbm [thread:$0]  %s147_s1, 128, %s272_s2, [#allocation3]  }
  0xdf   :  { %199 = dma.done.wait [#allocation3], 128  }
  0xe0   :  { %200 = vsyncadd [#allocation3], 4294967168 }
  0xe1   :  { %153 = vsyncpa [#allocation3], 1 }

</bundles_post_ra>
